<compile_context>
chip_gen: v5e
topology: v5e:2x2
jax: 0.10.0
libtpu: 0.0.40
codegen_flags: <defaults>
</compile_context>

<pallas_src>
import functools

import jax
import jax.numpy as jnp
from jax import lax
from jax.experimental import pallas as pl
from jax.experimental.pallas import tpu as pltpu


# ---------------------------------------------------------------------------
# Kernel A: per-batch GroupNorm statistics (streamed over spatial tiles).
# Emits fused affine params so the attention kernel does h = x*scale + shift.
# ---------------------------------------------------------------------------
def gn_stats_kernel(x_ref, mask_ref, maskT_ref, gamma_ref, beta_ref,
                    scale_ref, shift_ref, csum_s, csq_s, *, eps, inv_n):
    s = pl.program_id(1)

    @pl.when(s == 0)
    def _():
        csum_s[...] = jnp.zeros_like(csum_s)
        csq_s[...] = jnp.zeros_like(csq_s)

    x = x_ref[0]                                            # (TS, Cp) f32
    ones = jnp.ones((1, x.shape[0]), jnp.float32)
    # column sums via MXU (instead of cross-sublane XLU reduction chains)
    csum_s[...] += jnp.dot(ones, x, preferred_element_type=jnp.float32)
    csq_s[...] += jnp.dot(ones, x * x, preferred_element_type=jnp.float32)

    @pl.when(s == pl.num_programs(1) - 1)
    def _():
        # NOTE: one-pass E[x^2]-E[x]^2 in f32; adequate for roughly
        # zero-centered activation inputs (all stats accumulated in f32).
        gsum = jnp.dot(csum_s[...], mask_ref[...],
                       preferred_element_type=jnp.float32)   # (1, G)
        gsq = jnp.dot(csq_s[...], mask_ref[...],
                      preferred_element_type=jnp.float32)
        mean_g = gsum * inv_n
        var_g = gsq * inv_n - mean_g * mean_g
        inv_g = lax.rsqrt(var_g + eps)
        mean_c = jnp.dot(mean_g, maskT_ref[...],
                         preferred_element_type=jnp.float32)  # (1, Cp)
        inv_c = jnp.dot(inv_g, maskT_ref[...],
                        preferred_element_type=jnp.float32)
        sc = inv_c * gamma_ref[...]
        scale_ref[0] = sc
        shift_ref[0] = beta_ref[...] - mean_c * sc


# ---------------------------------------------------------------------------
# Kernel B: flash-style spatial self-attention + 1x1 proj + residual.
# Grid = (batch, query-tile, kv-tile); kv is the (innermost) reduction axis.
# K/V for the whole batch element are cached in VMEM at q == 0.
# ---------------------------------------------------------------------------
def attn_flash_kernel(scale_ref, shift_ref, xq_ref, xkv_ref, w_ref, b_ref,
                      o_ref, q_s, acc_s, m_s, l_s, kT_s, v_s, *, cp):
    qidx = pl.program_id(1)
    kv = pl.program_id(2)

    sc = scale_ref[0]                                        # (1, Cp)
    sh = shift_ref[0]

    @pl.when(kv == 0)
    def _():
        # GroupNorm for the query rows + q projection (attention scale is
        # folded into wq/bq in the wrapper). Computed once per query tile.
        hq = xq_ref[0] * sc + sh                             # (TQ, Cp) f32
        q = jnp.dot(hq.astype(jnp.bfloat16), w_ref[:, :cp],
                    preferred_element_type=jnp.float32) + b_ref[:, :cp]
        q_s[...] = q.astype(jnp.bfloat16)
        m_s[...] = jnp.full_like(m_s, -jnp.inf)
        l_s[...] = jnp.zeros_like(l_s)
        acc_s[...] = jnp.zeros_like(acc_s)

    @pl.when(qidx == 0)
    def _():
        # Fill the per-batch K/V cache once (first query tile only):
        # GroupNorm + fused k/v projection as a single (TK,C)@(C,2C) matmul.
        # K is stored pre-transposed so the score matmul needs no per-step
        # XLU transpose.
        hk = xkv_ref[0] * sc + sh                            # (TK, Cp) f32
        kvp = jnp.dot(hk.astype(jnp.bfloat16), w_ref[:, cp:3 * cp],
                      preferred_element_type=jnp.float32) + b_ref[:, cp:3 * cp]
        kT_s[kv] = jnp.transpose(kvp[:, :cp]).astype(jnp.bfloat16)  # (Cp, TK)
        v_s[kv] = kvp[:, cp:].astype(jnp.bfloat16)                  # (TK, Cp)

    kT = kT_s[kv]                                            # (Cp, TK) bf16
    v = v_s[kv]                                              # (TK, Cp) bf16

    # q @ k^T as a plain (TQ,Cp)@(Cp,TK) MXU matmul (k cached transposed).
    s = jnp.dot(q_s[...], kT, preferred_element_type=jnp.float32)  # (TQ, TK)

    # online softmax (exp/max/sum kept in f32 — v5e-safe)
    m_new = jnp.maximum(m_s[...], jnp.max(s, axis=-1, keepdims=True))
    alpha = jnp.exp(m_s[...] - m_new)
    p = jnp.exp(s - m_new)
    l_s[...] = alpha * l_s[...] + jnp.sum(p, axis=-1, keepdims=True)
    acc_s[...] = alpha * acc_s[...] + jnp.dot(p.astype(jnp.bfloat16), v,
                                              preferred_element_type=jnp.float32)
    m_s[...] = m_new

    @pl.when(kv == pl.num_programs(2) - 1)
    def _():
        # deferred softmax normalization: one EUP reciprocal per query row
        # instead of HW^2 divides of the score matrix.
        o = acc_s[...] * pl.reciprocal(l_s[...], approx=True)
        o = jnp.dot(o.astype(jnp.bfloat16), w_ref[:, 3 * cp:],
                    preferred_element_type=jnp.float32) + b_ref[:, 3 * cp:]
        o_ref[0] = xq_ref[0] + o                             # residual


# ---------------------------------------------------------------------------
# Wrapper
# ---------------------------------------------------------------------------
def _round_up(x, m):
    return (x + m - 1) // m * m


def _pick_tile(hw, target):
    """Largest divisor of hw that is <= target, preferring multiples of 256."""
    if hw <= target:
        return hw
    for step in (256, 8):
        t = (min(target, hw) // step) * step
        while t >= step:
            if hw % t == 0:
                return t
            t -= step
    return hw


def _vmem_cap_bytes():
    try:
        return int(pltpu.get_tpu_info().vmem_capacity_bytes)
    except Exception:
        return 64 << 20        # assume the smallest (v7x per-TC) VMEM


def _vmem_limit(nbytes):
    # generation-aware: never request more than physical VMEM minus headroom
    cap = _vmem_cap_bytes()
    return int(max(16 << 20, min(cap - (2 << 20), nbytes + (16 << 20))))


def attn_block(x_nchw, params, num_groups=32, eps=1e-6,
               q_tile=None, kv_tile=None):
    B, C, H, W = x_nchw.shape
    HW = H * W
    G = num_groups
    Cg = C // G
    Cp = _round_up(C, 128)                 # lane-dense channel dim

    if q_tile is None:
        q_tile = _pick_tile(HW, 512)
    if kv_tile is None:
        kv_tile = _pick_tile(HW, 1024)
    assert HW % q_tile == 0 and HW % kv_tile == 0
    # kernel A is HBM-bound with tiny compute: use large tiles independently.
    s_tile = _pick_tile(HW, 2048)
    n_q, n_kv, n_s = HW // q_tile, HW // kv_tile, HW // s_tile

    f32 = jnp.float32
    # channels-last, flattened spatial, zero-padded channels
    x = jnp.transpose(x_nchw, (0, 2, 3, 1)).reshape(B, HW, C).astype(f32)
    x = jnp.pad(x, ((0, 0), (0, 0), (0, Cp - C)))

    # one-hot channel -> group membership (padded channels belong to no group)
    grp = jnp.arange(C) // Cg
    mask = jnp.zeros((Cp, G), f32).at[jnp.arange(C), grp].set(1.0)
    maskT = mask.T

    def padc(v):
        return jnp.pad(v.astype(f32).reshape(-1), (0, Cp - C)).reshape(1, Cp)

    def padw(w):
        return jnp.pad(w.astype(f32), ((0, Cp - C), (0, Cp - C)))

    gamma, beta = padc(params["gamma"]), padc(params["beta"])

    sa = float(C) ** -0.5                  # attention scale folded into q proj
    # packed bf16 weight slab [wq*sa | wk | wv | wp] and f32 bias slab
    w_slab = jnp.concatenate(
        [padw(params["wq"].T) * sa, padw(params["wk"].T),
         padw(params["wv"].T), padw(params["wp"].T)],
        axis=1).astype(jnp.bfloat16)                          # (Cp, 4Cp)
    b_slab = jnp.concatenate(
        [padc(params["bq"]) * sa, padc(params["bk"]),
         padc(params["bv"]), padc(params["bp"])], axis=1)     # (1, 4Cp) f32

    # ---- kernel A: GroupNorm stats -> per-batch (scale, shift) ----
    vmem_a = (2 * 4 * (s_tile * Cp + Cp * G + G * Cp + 4 * Cp + 2 * Cp)
              + 8 * Cp)
    scale_c, shift_c = pl.pallas_call(
        functools.partial(gn_stats_kernel, eps=eps,
                          inv_n=1.0 / float(HW * Cg)),
        out_shape=(jax.ShapeDtypeStruct((B, 1, Cp), f32),
                   jax.ShapeDtypeStruct((B, 1, Cp), f32)),
        grid_spec=pltpu.PrefetchScalarGridSpec(
            num_scalar_prefetch=0,
            grid=(B, n_s),
            in_specs=[
                pl.BlockSpec((1, s_tile, Cp), lambda b, s: (b, s, 0)),  # x
                pl.BlockSpec((Cp, G), lambda b, s: (0, 0)),             # mask
                pl.BlockSpec((G, Cp), lambda b, s: (0, 0)),             # mask.T
                pl.BlockSpec((1, Cp), lambda b, s: (0, 0)),             # gamma
                pl.BlockSpec((1, Cp), lambda b, s: (0, 0)),             # beta
            ],
            out_specs=[
                pl.BlockSpec((1, 1, Cp), lambda b, s: (b, 0, 0)),
                pl.BlockSpec((1, 1, Cp), lambda b, s: (b, 0, 0)),
            ],
            scratch_shapes=[pltpu.VMEM((1, Cp), f32),
                            pltpu.VMEM((1, Cp), f32)]),
        compiler_params=pltpu.CompilerParams(
            dimension_semantics=("parallel", "arbitrary"),
            vmem_limit_bytes=_vmem_limit(vmem_a)),
    )(x, mask, maskT, gamma, beta)

    # ---- kernel B: flash attention + proj_out + residual ----
    bpf, bph = 4, 2
    vmem_b = (2 * (2 * Cp * bpf                # scale + shift blocks
                   + q_tile * Cp * bpf         # xq block
                   + kv_tile * Cp * bpf        # xkv block
                   + Cp * 4 * Cp * bph         # weight slab
                   + 4 * Cp * bpf              # bias slab
                   + q_tile * Cp * bpf)        # output block
              + q_tile * Cp * bph              # q scratch
              + q_tile * Cp * bpf              # acc scratch
              + 2 * q_tile * 128 * bpf         # m / l scratch (lane padded)
              + 2 * HW * Cp * bph)             # K^T / V caches
    out = pl.pallas_call(
        functools.partial(attn_flash_kernel, cp=Cp),
        out_shape=jax.ShapeDtypeStruct((B, HW, Cp), f32),
        grid_spec=pltpu.PrefetchScalarGridSpec(
            num_scalar_prefetch=0,
            grid=(B, n_q, n_kv),
            in_specs=[
                pl.BlockSpec((1, 1, Cp), lambda b, q, k: (b, 0, 0)),       # scale
                pl.BlockSpec((1, 1, Cp), lambda b, q, k: (b, 0, 0)),       # shift
                pl.BlockSpec((1, q_tile, Cp), lambda b, q, k: (b, q, 0)),  # x (q rows)
                # kv rows of x are only consumed while filling the K/V cache
                # (q == 0); keep the block index constant afterwards so the
                # pipeline stops re-streaming them from HBM.
                pl.BlockSpec((1, kv_tile, Cp),
                             lambda b, q, k: (b, jnp.where(q == 0, k, 0), 0)),
                pl.BlockSpec((Cp, 4 * Cp), lambda b, q, k: (0, 0)),        # weights
                pl.BlockSpec((1, 4 * Cp), lambda b, q, k: (0, 0)),         # biases
            ],
            out_specs=pl.BlockSpec((1, q_tile, Cp), lambda b, q, k: (b, q, 0)),
            scratch_shapes=[
                pltpu.VMEM((q_tile, Cp), jnp.bfloat16),     # q (bf16)
                pltpu.VMEM((q_tile, Cp), f32),              # acc
                pltpu.VMEM((q_tile, 1), f32),               # running max
                pltpu.VMEM((q_tile, 1), f32),               # running sum
                pltpu.VMEM((n_kv, Cp, kv_tile), jnp.bfloat16),  # K^T cache (per batch)
                pltpu.VMEM((n_kv, kv_tile, Cp), jnp.bfloat16),  # V   cache (per batch)
            ]),
        compiler_params=pltpu.CompilerParams(
            # q must stay "arbitrary": the per-batch K/V cache is filled at
            # q == 0 and reused by later q tiles on the same core; batch stays
            # "parallel" for megacore sharding.
            dimension_semantics=("parallel", "arbitrary", "arbitrary"),
            vmem_limit_bytes=_vmem_limit(vmem_b)),
    )(scale_c, shift_c, x, x, w_slab, b_slab)

    out = out[:, :, :C].reshape(B, H, W, C)
    return jnp.transpose(out, (0, 3, 1, 2))


# ---------------------------------------------------------------------------
# Pure-JAX reference matching the PyTorch AttnBlock forward exactly.
# ---------------------------------------------------------------------------
def attn_block_reference(x_nchw, params, num_groups=32, eps=1e-6):
    B, C, H, W = x_nchw.shape
    G = num_groups
    Cg = C // G
    xg = x_nchw.reshape(B, G, Cg, H, W)
    mean = xg.mean(axis=(2, 3, 4), keepdims=True)
    var = xg.var(axis=(2, 3, 4), keepdims=True)
    hn = ((xg - mean) / jnp.sqrt(var + eps)).reshape(B, C, H, W)
    hn = hn * params["gamma"][None, :, None, None] + params["beta"][None, :, None, None]

    def conv1x1(h, w, b):
        return jnp.einsum("bchw,oc->bohw", h, w) + b[None, :, None, None]

    q = conv1x1(hn, params["wq"], params["bq"])
    k = conv1x1(hn, params["wk"], params["bk"])
    v = conv1x1(hn, params["wv"], params["bv"])
    HW = H * W
    q = q.reshape(B, C, HW).transpose(0, 2, 1)
    k = k.reshape(B, C, HW)
    w_ = jnp.einsum("bic,bcj->bij", q, k) * (float(C) ** -0.5)
    w_ = jax.nn.softmax(w_, axis=2)
    v = v.reshape(B, C, HW)
    h_ = jnp.einsum("bcj,bij->bci", v, w_).reshape(B, C, H, W)
    h_ = conv1x1(h_, params["wp"], params["bp"])
    return x_nchw + h_


if __name__ == "__main__":
    B, C, H, W = 2, 32, 16, 16   # in_channels=32 so GroupNorm(32) divides evenly

    key = jax.random.PRNGKey(0)
    ks = jax.random.split(key, 12)
    params = {
        "gamma": 1.0 + 0.05 * jax.random.normal(ks[0], (C,), jnp.float32),
        "beta": 0.05 * jax.random.normal(ks[1], (C,), jnp.float32),
        "wq": 0.1 * jax.random.normal(ks[2], (C, C), jnp.float32),
        "bq": 0.05 * jax.random.normal(ks[3], (C,), jnp.float32),
        "wk": 0.1 * jax.random.normal(ks[4], (C, C), jnp.float32),
        "bk": 0.05 * jax.random.normal(ks[5], (C,), jnp.float32),
        "wv": 0.1 * jax.random.normal(ks[6], (C, C), jnp.float32),
        "bv": 0.05 * jax.random.normal(ks[7], (C,), jnp.float32),
        "wp": 0.1 * jax.random.normal(ks[8], (C, C), jnp.float32),
        "bp": 0.05 * jax.random.normal(ks[9], (C,), jnp.float32),
    }
    x = jax.random.normal(ks[10], (B, C, H, W), jnp.float32)

    # HW=256 with 128x128 tiles -> two query tiles x two kv steps: exercises
    # the K/V-cache fill (q==0) and reuse (q>0) paths with lane-aligned tiles.
    out = attn_block(x, params, q_tile=128, kv_tile=128)
    out = jax.block_until_ready(out)

    ref = attn_block_reference(x, params)
    assert out.shape == (B, C, H, W)
    err = float(jnp.max(jnp.abs(out - ref)))
    # bf16 matmuls + approx reciprocal -> relaxed tolerance vs f32 reference
    assert jnp.allclose(out, ref, atol=2e-2, rtol=2e-2), f"max abs err {err}"
    print("KERNEL_OK")
</pallas_src>

<mosaic_0001>
module attributes {stable_mosaic.version = 11 : i64} {
  func.func @gn_stats_kernel(%arg0: i32, %arg1: i32, %arg2: memref<1x256x128xf32, #tpu.memory_space<vmem>>, %arg3: memref<128x32xf32, #tpu.memory_space<vmem>>, %arg4: memref<32x128xf32, #tpu.memory_space<vmem>>, %arg5: memref<1x128xf32, #tpu.memory_space<vmem>>, %arg6: memref<1x128xf32, #tpu.memory_space<vmem>>, %arg7: memref<1x1x128xf32, #tpu.memory_space<vmem>>, %arg8: memref<1x1x128xf32, #tpu.memory_space<vmem>>, %arg9: memref<1x128xf32, #tpu.memory_space<vmem>>, %arg10: memref<1x128xf32, #tpu.memory_space<vmem>>) attributes {dimension_semantics = [#tpu.dimension_semantics<parallel>, #tpu.dimension_semantics<arbitrary>], iteration_bounds = array<i64: 2, 1>, scalar_prefetch = 0 : i64, scratch_operands = 2 : i64, tpu.core_type = #tpu.core_type<tc>, window_params = [{transform_indices = @transform_0, window_bounds = array<i64: 1, 256, 128>}, {pipeline_mode = #tpu.pipeline_mode<synchronous>, transform_indices = @transform_1, window_bounds = array<i64: 128, 32>}, {pipeline_mode = #tpu.pipeline_mode<synchronous>, transform_indices = @transform_2, window_bounds = array<i64: 32, 128>}, {pipeline_mode = #tpu.pipeline_mode<synchronous>, transform_indices = @transform_3, window_bounds = array<i64: 1, 128>}, {pipeline_mode = #tpu.pipeline_mode<synchronous>, transform_indices = @transform_4, window_bounds = array<i64: 1, 128>}, {transform_indices = @transform_5, window_bounds = array<i64: 1, 1, 128>}, {transform_indices = @transform_6, window_bounds = array<i64: 1, 1, 128>}]} {
    %c0_i32 = arith.constant 0 : i32
    %0 = arith.cmpi eq, %arg1, %c0_i32 : i32
    %1 = arith.extui %0 : i1 to i32
    %c0_i32_0 = arith.constant 0 : i32
    %2 = arith.cmpi ne, %1, %c0_i32_0 : i32
    scf.if %2 {
      %cst_15 = arith.constant 0.000000e+00 : f32
      %18 = vector.broadcast %cst_15 : f32 to vector<1x128xf32>
      %c0_16 = arith.constant 0 : index
      %c0_17 = arith.constant 0 : index
      %19 = vector.load %arg9[%c0_16, %c0_17] : memref<1x128xf32, #tpu.memory_space<vmem>>, vector<1x128xf32>
      tpu.vector_store %arg9[%c0_16, %c0_17], %18 {strides = array<i32>} : memref<1x128xf32, #tpu.memory_space<vmem>>, vector<1x128xf32>,
      %cst_18 = arith.constant 0.000000e+00 : f32
      %20 = vector.broadcast %cst_18 : f32 to vector<1x128xf32>
      %c0_19 = arith.constant 0 : index
      %c0_20 = arith.constant 0 : index
      %21 = vector.load %arg10[%c0_19, %c0_20] : memref<1x128xf32, #tpu.memory_space<vmem>>, vector<1x128xf32>
      tpu.vector_store %arg10[%c0_19, %c0_20], %20 {strides = array<i32>} : memref<1x128xf32, #tpu.memory_space<vmem>>, vector<1x128xf32>,
    } else {
    }
    %c0 = arith.constant 0 : index
    %c0_1 = arith.constant 0 : index
    %c0_2 = arith.constant 0 : index
    %3 = vector.load %arg2[%c0, %c0_1, %c0_2] : memref<1x256x128xf32, #tpu.memory_space<vmem>>, vector<1x256x128xf32>
    %4 = vector.shape_cast %3 : vector<1x256x128xf32> to vector<256x128xf32>
    %cst = arith.constant 1.000000e+00 : f32
    %5 = vector.broadcast %cst : f32 to vector<1x256xf32>
    %c0_3 = arith.constant 0 : index
    %c0_4 = arith.constant 0 : index
    %6 = vector.load %arg9[%c0_3, %c0_4] : memref<1x128xf32, #tpu.memory_space<vmem>>, vector<1x128xf32>
    %cst_5 = arith.constant dense<0.000000e+00> : vector<1x128xf32>
    %7 = tpu.matmul %5, %4, %cst_5 {dimension_numbers = #tpu.dot_dimension_numbers<[1], [0], [0], [1], [0, 0, 1, 1], [], []>} : vector<1x256xf32>, vector<256x128xf32>, vector<1x128xf32> -> vector<1x128xf32>
    %8 = arith.addf %6, %7 : vector<1x128xf32>
    %c0_6 = arith.constant 0 : index
    %c0_7 = arith.constant 0 : index
    %9 = vector.load %arg9[%c0_6, %c0_7] : memref<1x128xf32, #tpu.memory_space<vmem>>, vector<1x128xf32>
    tpu.vector_store %arg9[%c0_6, %c0_7], %8 {strides = array<i32>} : memref<1x128xf32, #tpu.memory_space<vmem>>, vector<1x128xf32>,
    %c0_8 = arith.constant 0 : index
    %c0_9 = arith.constant 0 : index
    %10 = vector.load %arg10[%c0_8, %c0_9] : memref<1x128xf32, #tpu.memory_space<vmem>>, vector<1x128xf32>
    %11 = arith.mulf %4, %4 : vector<256x128xf32>
    %cst_10 = arith.constant dense<0.000000e+00> : vector<1x128xf32>
    %12 = tpu.matmul %5, %11, %cst_10 {dimension_numbers = #tpu.dot_dimension_numbers<[1], [0], [0], [1], [0, 0, 1, 1], [], []>} : vector<1x256xf32>, vector<256x128xf32>, vector<1x128xf32> -> vector<1x128xf32>
    %13 = arith.addf %10, %12 : vector<1x128xf32>
    %c0_11 = arith.constant 0 : index
    %c0_12 = arith.constant 0 : index
    %14 = vector.load %arg10[%c0_11, %c0_12] : memref<1x128xf32, #tpu.memory_space<vmem>>, vector<1x128xf32>
    tpu.vector_store %arg10[%c0_11, %c0_12], %13 {strides = array<i32>} : memref<1x128xf32, #tpu.memory_space<vmem>>, vector<1x128xf32>,
    %c0_i32_13 = arith.constant 0 : i32
    %15 = arith.cmpi eq, %arg1, %c0_i32_13 : i32
    %16 = arith.extui %15 : i1 to i32
    %c0_i32_14 = arith.constant 0 : i32
    %17 = arith.cmpi ne, %16, %c0_i32_14 : i32
    scf.if %17 {
      %c0_15 = arith.constant 0 : index
      %c0_16 = arith.constant 0 : index
      %18 = vector.load %arg9[%c0_15, %c0_16] : memref<1x128xf32, #tpu.memory_space<vmem>>, vector<1x128xf32>
      %c0_17 = arith.constant 0 : index
      %c0_18 = arith.constant 0 : index
      %19 = vector.load %arg3[%c0_17, %c0_18] : memref<128x32xf32, #tpu.memory_space<vmem>>, vector<128x32xf32>
      %cst_19 = arith.constant dense<0.000000e+00> : vector<1x32xf32>
      %20 = tpu.matmul %18, %19, %cst_19 {dimension_numbers = #tpu.dot_dimension_numbers<[1], [0], [0], [1], [0, 0, 1, 1], [], []>} : vector<1x128xf32>, vector<128x32xf32>, vector<1x32xf32> -> vector<1x32xf32>
      %c0_20 = arith.constant 0 : index
      %c0_21 = arith.constant 0 : index
      %21 = vector.load %arg10[%c0_20, %c0_21] : memref<1x128xf32, #tpu.memory_space<vmem>>, vector<1x128xf32>
      %c0_22 = arith.constant 0 : index
      %c0_23 = arith.constant 0 : index
      %22 = vector.load %arg3[%c0_22, %c0_23] : memref<128x32xf32, #tpu.memory_space<vmem>>, vector<128x32xf32>
      %cst_24 = arith.constant dense<0.000000e+00> : vector<1x32xf32>
      %23 = tpu.matmul %21, %22, %cst_24 {dimension_numbers = #tpu.dot_dimension_numbers<[1], [0], [0], [1], [0, 0, 1, 1], [], []>} : vector<1x128xf32>, vector<128x32xf32>, vector<1x32xf32> -> vector<1x32xf32>
      %cst_25 = arith.constant 3.906250e-03 : f32
      %24 = vector.broadcast %cst_25 : f32 to vector<1x32xf32>
      %25 = arith.mulf %20, %24 : vector<1x32xf32>
      %cst_26 = arith.constant 3.906250e-03 : f32
      %26 = vector.broadcast %cst_26 : f32 to vector<1x32xf32>
      %27 = arith.mulf %23, %26 : vector<1x32xf32>
      %28 = arith.mulf %25, %25 : vector<1x32xf32>
      %29 = arith.subf %27, %28 : vector<1x32xf32>
      %cst_27 = arith.constant 9.99999997E-7 : f32
      %30 = vector.broadcast %cst_27 : f32 to vector<1x32xf32>
      %31 = arith.addf %29, %30 : vector<1x32xf32>
      %32 = math.rsqrt %31 : vector<1x32xf32>
      %c0_28 = arith.constant 0 : index
      %c0_29 = arith.constant 0 : index
      %33 = vector.load %arg4[%c0_28, %c0_29] : memref<32x128xf32, #tpu.memory_space<vmem>>, vector<32x128xf32>
      %cst_30 = arith.constant dense<0.000000e+00> : vector<1x128xf32>
      %34 = tpu.matmul %25, %33, %cst_30 {dimension_numbers = #tpu.dot_dimension_numbers<[1], [0], [0], [1], [0, 0, 1, 1], [], []>} : vector<1x32xf32>, vector<32x128xf32>, vector<1x128xf32> -> vector<1x128xf32>
      %c0_31 = arith.constant 0 : index
      %c0_32 = arith.constant 0 : index
      %35 = vector.load %arg4[%c0_31, %c0_32] : memref<32x128xf32, #tpu.memory_space<vmem>>, vector<32x128xf32>
      %cst_33 = arith.constant dense<0.000000e+00> : vector<1x128xf32>
      %36 = tpu.matmul %32, %35, %cst_33 {dimension_numbers = #tpu.dot_dimension_numbers<[1], [0], [0], [1], [0, 0, 1, 1], [], []>} : vector<1x32xf32>, vector<32x128xf32>, vector<1x128xf32> -> vector<1x128xf32>
      %c0_34 = arith.constant 0 : index
      %c0_35 = arith.constant 0 : index
      %37 = vector.load %arg5[%c0_34, %c0_35] : memref<1x128xf32, #tpu.memory_space<vmem>>, vector<1x128xf32>
      %38 = arith.mulf %36, %37 : vector<1x128xf32>
      %c0_36 = arith.constant 0 : index
      %c0_37 = arith.constant 0 : index
      %c0_38 = arith.constant 0 : index
      %39 = vector.load %arg7[%c0_36, %c0_37, %c0_38] : memref<1x1x128xf32, #tpu.memory_space<vmem>>, vector<1x1x128xf32>
      %40 = vector.shape_cast %39 : vector<1x1x128xf32> to vector<1x128xf32>
      %41 = vector.shape_cast %38 : vector<1x128xf32> to vector<1x1x128xf32>
      tpu.vector_store %arg7[%c0_36, %c0_37, %c0_38], %41 {strides = array<i32>} : memref<1x1x128xf32, #tpu.memory_space<vmem>>, vector<1x1x128xf32>,
      %c0_39 = arith.constant 0 : index
      %c0_40 = arith.constant 0 : index
      %42 = vector.load %arg6[%c0_39, %c0_40] : memref<1x128xf32, #tpu.memory_space<vmem>>, vector<1x128xf32>
      %43 = arith.mulf %34, %38 : vector<1x128xf32>
      %44 = arith.subf %42, %43 : vector<1x128xf32>
      %c0_41 = arith.constant 0 : index
      %c0_42 = arith.constant 0 : index
      %c0_43 = arith.constant 0 : index
      %45 = vector.load %arg8[%c0_41, %c0_42, %c0_43] : memref<1x1x128xf32, #tpu.memory_space<vmem>>, vector<1x1x128xf32>
      %46 = vector.shape_cast %45 : vector<1x1x128xf32> to vector<1x128xf32>
      %47 = vector.shape_cast %44 : vector<1x128xf32> to vector<1x1x128xf32>
      tpu.vector_store %arg8[%c0_41, %c0_42, %c0_43], %47 {strides = array<i32>} : memref<1x1x128xf32, #tpu.memory_space<vmem>>, vector<1x1x128xf32>,
    } else {
    }
    return
  }
  func.func @transform_0(%arg0: i32, %arg1: i32) -> (i32, i32, i32) {
    %c0_i32 = arith.constant 0 : i32
    %c0_i32_0 = arith.constant 0 : i32
    return %arg0, %arg1, %c0_i32 : i32, i32, i32
  }
  func.func @transform_1(%arg0: i32, %arg1: i32) -> (i32, i32) {
    %c0_i32 = arith.constant 0 : i32
    %c0_i32_0 = arith.constant 0 : i32
    %c0_i32_1 = arith.constant 0 : i32
    return %c0_i32, %c0_i32_0 : i32, i32
  }
  func.func @transform_2(%arg0: i32, %arg1: i32) -> (i32, i32) {
    %c0_i32 = arith.constant 0 : i32
    %c0_i32_0 = arith.constant 0 : i32
    %c0_i32_1 = arith.constant 0 : i32
    return %c0_i32, %c0_i32_0 : i32, i32
  }
  func.func @transform_3(%arg0: i32, %arg1: i32) -> (i32, i32) {
    %c0_i32 = arith.constant 0 : i32
    %c0_i32_0 = arith.constant 0 : i32
    %c0_i32_1 = arith.constant 0 : i32
    return %c0_i32, %c0_i32_0 : i32, i32
  }
  func.func @transform_4(%arg0: i32, %arg1: i32) -> (i32, i32) {
    %c0_i32 = arith.constant 0 : i32
    %c0_i32_0 = arith.constant 0 : i32
    %c0_i32_1 = arith.constant 0 : i32
    return %c0_i32, %c0_i32_0 : i32, i32
  }
  func.func @transform_5(%arg0: i32, %arg1: i32) -> (i32, i32, i32) {
    %c0_i32 = arith.constant 0 : i32
    %c0_i32_0 = arith.constant 0 : i32
    %c0_i32_1 = arith.constant 0 : i32
    return %arg0, %c0_i32, %c0_i32_0 : i32, i32, i32
  }
  func.func @transform_6(%arg0: i32, %arg1: i32) -> (i32, i32, i32) {
    %c0_i32 = arith.constant 0 : i32
    %c0_i32_0 = arith.constant 0 : i32
    %c0_i32_1 = arith.constant 0 : i32
    return %arg0, %c0_i32, %c0_i32_0 : i32, i32, i32
  }
}

</mosaic_0001>

<bundles_post_ra>
// kernel: tpu_custom_call.1
= control target key start
LH: loop header
LB: loop body
LE: loop exit
PB: predicated region body
PF: predicated region fallthrough
CT: control target
= control target key end

     0   :  { %12 = vsyncpa [#allocation5], 0  ;;  %s1243_s0 = inlined_call_operand.hbm [shape: f32[2,256,128], index: 0, kind: input, shape index: {}]   ;;  %s1244_s1 = inlined_call_operand.vmem [shape: f32[128,32], index: 1, kind: input, shape index: {}]   ;;  %s1245_s2 = inlined_call_operand.vmem [shape: f32[32,128], index: 2, kind: input, shape index: {}]   ;;  %s1246_s3 = inlined_call_operand.vmem [shape: f32[1,128], index: 3, kind: input, shape index: {}]   ;;  %s1247_s4 = inlined_call_operand.vmem [shape: f32[1,128], index: 4, kind: input, shape index: {}]   ;;  %s1248_s5 = inlined_call_operand.hbm [shape: f32[2,1,128], index: 5, kind: output, shape index: {0}]   ;;  %s1249_s6 = inlined_call_operand.hbm [shape: f32[2,1,128], index: 6, kind: output, shape index: {1}]  }
   0x1   :  { %14 = vsyncpa [#allocation5 + $0x1], 0 }
   0x2   :  { %15 = vsyncpa [#allocation6], 0 }
   0x3   :  { %17 = vsyncpa [#allocation6 + $0x1], 0 }
   0x4   :  { %18 = vsyncpa [#allocation9], 0 }
   0x5   :  { %20 = vsyncpa [#allocation9 + $0x1], 0  ;;  %s995_s21 = smov 0   ;;  %s997_s22 = smov 0  }
   0x6   :  { %s999_s23 = smov 0   ;;  %s1001_s24 = smov 0  }
   0x7   :  { %s1003_s25 = smov 0   ;;  %s1005_s26 = smov 0  }
   0x8 LB: > { %s723_s27 = sadd.s32 4294967295, %s954_s26   ;;  %s724_s28 = sadd.s32 4294967294, %s954_s26   ;;  %s954_s26 = sphi %s1005_s26, %s26_s26   ;;  %s950_s25 = sphi %s1003_s25, %s1261_s25   ;;  %s946_s24 = sphi %s1001_s24, %s1260_s24   ;;  %s942_s23 = sphi %s999_s23, %s1259_s23   ;;  %s938_s22 = sphi %s997_s22, %s1258_s22   ;;  %s934_s21 = sphi %s995_s21, %s1257_s21  }
   0x9   : > { %s38_s29 = sadd.s32 1, %s950_s25  ;;  %s47_s30 = sadd.s32 1, %s942_s23 }
   0xa   : > { %p40_p0 = scmp.ge.s32.totalorder %s38_s29, 2  ;;  %p54_p1 = scmp.ne.s32.totalorder %s942_s23, %s938_s22 }
   0xb   : > { %p55_p2 = scmp.eq.s32.totalorder %s954_s26, 0  ;;  %p60_p3 = scmp.ne.s32.totalorder %s938_s22, %s934_s21 }
   0xc   : > { %s1263_s29 = smov (%p40_p0, %s38_s29), 0  ;;  %p61_p5 = scmp.eq.s32.totalorder %s723_s27, 0 }
   0xd   : > { %1251 = sst [smem:[#allocation13_spill]] %s1263_s29  ;;  %p1036_p4 = por %p55_p2, %p54_p1 }
   0xe   : > { %s42_s8 = ssub.s32 %s950_s25, %s1263_s29  ;;  %p168_p6 = scmp.eq.s32.totalorder %s723_s27, 1 }
   0xf   : > { %p45_p7 = scmp.eq.s32.totalorder %s42_s8, 0  ;;  %p1042_p8 = por %p61_p5, %p60_p3 }
  0x10   : > { %p1046_p9 = por %p168_p6, %p54_p1  ;;  %p174_p10 = scmp.eq.s32.totalorder %s724_s28, 1 }
  0x11   : > { %s1051_s11 = scalar_select %p45_p7, %s942_s23, %s47_s30  }
  0x12   : > { %p1053_p11 = por %p174_p10, %p60_p3  ;;  %p726_p12 = scmp.ge.s32.totalorder %s954_s26, 2 }
  0x13   : > { %p754_p13 = scmp.lt.s32.totalorder %s954_s26, 2  ;;  %s232_s13 = sand.u32 1, %s942_s23  }
  0x14   : > { %s727_s14 = sshll.u32 %s232_s13, 8  ;;  %s736_s15 = sshll.u32 %s950_s25, 8 }
  0x15   : > { %s243_s18 = scalar_lea.hbm %s1243_s0, %s736_s15  ;;  %s236_s19 = scalar_lea.vmem [#allocation4], %s727_s14 }
  0x16   : > { %s246_s20 = sshll.u32 %s236_s19, 4  ;;  %s244_s27 = sshll.u32 %s243_s18, 4  ;;  %s247_s20 = int_to_ptr.vmem [resolvable:$true] %s246_s20  ;;  %s245_s27 = int_to_ptr.hbm [resolvable:$true] %s244_s27 }
  0x17   : > { %p744_p0 = pnand %p754_p13, %p1036_p4  ;;  %p730_p1 = scmp.ge.s32.totalorder %s954_s26, 1 }
  0x18   : > { %s233_s28 = scalar_lea.sflag [#allocation5], %s232_s13  ;;  %s956_s30 = smov 128  }
  0x19   : > { %s957_s8 = smov 8   ;;  %p254_p2 = scmp.lt.s32.totalorder %s954_s26, 3 }
  0x1a   : > { %746 = dma.hbm_to_vmem [thread:$0]  (!%p744_p0), %s245_s27, 4096, %s247_s20, %s233_s28, %s956_s30, %s956_s30, %s957_s8  }
  0x1b   : > { %p255_p3 = pnand %p730_p1, %p254_p2 }
  0x1c   : > { %s1069_s29 = sand.u32 (!%p255_p3), 1, %s938_s22  }
  0x1d   : > { %258 = sbr.rel (%p255_p3) target bundleno = 513 (0x201), region = 40  ;;  %s731_s14 = sshll.u32 (!%p255_p3), %s1069_s29, 8 }
  0x1e   : > { %s261_s15 = scalar_lea.sflag (!%p255_p3), [#allocation5], %s1069_s29  ;;  %s1073_s16 = scalar_lea.vmem (!%p255_p3), [#allocation4], %s731_s14 }
  0x22   : > { %921 = dma.done.wait (%p1042_p8), %s261_s15, 4096  }
  0x23   : > { %923 = vsyncadd (%p1042_p8), %s261_s15, 4294963200  ;;  %v319_v0 = vld [vmem:[%s1073_s16 + $0x78] sm:$0xff]  ;;  %v318_v2 = vld [vmem:[%s1073_s16 + $0x70] sm:$0xff]  ;;  %vm534_vm0 = vcmask 261120   ;;  %s601_s7 = scalar_lea.hbm %s1248_s5, %s946_s24  ;;  %s290_s17 = scalar_lea.vmem [#allocation7], %s1069_s29 }
  0x24   : > { %v335_v1 = vld [vmem:[%s1073_s16 + $0xf8] sm:$0xff]  ;;  %v395_v3 = vmul.f32 %v319_v0, %v319_v0  ;;  %v394_v5 = vmul.f32 %v318_v2, %v318_v2  ;;  %v334_v6 = vld [vmem:[%s1073_s16 + $0xf0] sm:$0xff]  ;;  %337 = vmatpush.msra.mxu0 %v319_v0  ;;  %v317_v7 = vld [vmem:[%s1073_s16 + $0x68] sm:$0xff]  ;;  %s1181_s18 = sshll.u32 %s290_s17, 4  ;;  %s605_s19 = sshll.u32 %s601_s7, 4  ;;  %s604_s18 = int_to_ptr.vmem [resolvable:$true] %s1181_s18  ;;  %s606_s19 = int_to_ptr.hbm [resolvable:$true] %s605_s19 }
  0x25   : > { %v411_v4 = vmul.f32 %v335_v1, %v335_v1  ;;  %357 = vmatpush.msra.mxu1 %v335_v1  ;;  %v333_v8 = vld [vmem:[%s1073_s16 + $0xe8] sm:$0xff]  ;;  %v410_v9 = vmul.f32 %v334_v6, %v334_v6  ;;  %v316_v10 = vld [vmem:[%s1073_s16 + $0x60] sm:$0xff]  ;;  %v393_v12 = vmul.f32 %v317_v7, %v317_v7  ;;  %v315_v14 = vld [vmem:[%s1073_s16 + $0x58] sm:$0xff]  ;;  %v958_v1 = vmov 1.0   ;;  %s614_s28 = scalar_lea.hbm %s1249_s6, %s946_s24  ;;  %s296_s14 = scalar_lea.vmem [#allocation8], %s1069_s29 }
  0x26   : > { %v332_v11 = vld [vmem:[%s1073_s16 + $0xe0] sm:$0xff]  ;;  %412 = vmatpush.msra.mxu2 %v395_v3  ;;  %v409_v13 = vmul.f32 %v333_v8, %v333_v8  ;;  %338 = vmatpush.msra.mxu0 %v318_v2  ;;  %v331_v15 = vld [vmem:[%s1073_s16 + $0xd8] sm:$0xff]  ;;  %v392_v16 = vmul.f32 %v316_v10, %v316_v10  ;;  %v314_v18 = vld [vmem:[%s1073_s16 + $0x50] sm:$0xff]  ;;  %v391_v20 = vmul.f32 %v315_v14, %v315_v14  ;;  %s1192_s15 = sshll.u32 %s296_s14, 4  ;;  %s589_s7 = scalar_lea.sflag [#allocation6], %s1069_s29  ;;  %s617_s15 = int_to_ptr.vmem [resolvable:$true] %s1192_s15 }
  0x27   : > { %432 = vmatpush.msra.mxu3 %v411_v4  ;;  %358 = vmatpush.msra.mxu1 %v334_v6  ;;  %v408_v17 = vmul.f32 %v332_v11, %v332_v11  ;;  %v330_v19 = vld [vmem:[%s1073_s16 + $0xd0] sm:$0xff]  ;;  %v407_v21 = vmul.f32 %v331_v15, %v331_v15  ;;  %v313_v22 = vld [vmem:[%s1073_s16 + $0x48] sm:$0xff]  ;;  %v390_v24 = vmul.f32 %v314_v18, %v314_v18  ;;  %v312_v26 = vld [vmem:[%s1073_s16 + $0x40] sm:$0xff]  ;;  %s854_s9 = sshra.s32 %s606_s19, 4  ;;  %s860_s27 = scalar_lea.hbm %s1248_s5, 2  ;;  %s855_s9 = int_to_ptr.hbm [resolvable:$true] %s854_s9 }
  0x28   : > { %413 = vmatpush.msra.mxu2 %v394_v5  ;;  %339 = vmatpush.msra.mxu0 %v317_v7  ;;  %v329_v23 = vld [vmem:[%s1073_s16 + $0xc8] sm:$0xff]  ;;  %v406_v25 = vmul.f32 %v330_v19, %v330_v19  ;;  %v328_v27 = vld [vmem:[%s1073_s16 + $0xc0] sm:$0xff]  ;;  %v389_v28 = vmul.f32 %v313_v22, %v313_v22  ;;  %v311_v30 = vld [vmem:[%s1073_s16 + $0x38] sm:$0xff]  ;;  %v388_v32 = vmul.f32 %v312_v26, %v312_v26  ;;  %s856_s24 = scalar_lea.hbm %s855_s9, 1  ;;  %p861_p7 = scmp.lt.s32.totalorder %s855_s9, %s1248_s5 }
  0x29   : > { %433 = vmatpush.msra.mxu3 %v410_v9  ;;  %359 = vmatpush.msra.mxu1 %v333_v8  ;;  %v405_v29 = vmul.f32 %v329_v23, %v329_v23  ;;  %v327_v31 = vld [vmem:[%s1073_s16 + $0xb8] sm:$0xff]  ;;  %v404_v33 = vmul.f32 %v328_v27, %v328_v27  ;;  %v310_v34 = vld [vmem:[%s1073_s16 + $0x30] sm:$0xff]  ;;  %v387_v36 = vmul.f32 %v311_v30, %v311_v30  ;;  %v309_v38 = vld [vmem:[%s1073_s16 + $0x28] sm:$0xff]  ;;  %p857_p4 = scmp.ne.s32.totalorder %s855_s9, %s856_s24  ;;  %p862_p8 = scmp.lt.s32.totalorder %s860_s27, %s856_s24 }
  0x2a   : > { %414 = vmatpush.msra.mxu2 %v393_v12  ;;  %340 = vmatpush.msra.mxu0 %v316_v10  ;;  %v326_v35 = vld [vmem:[%s1073_s16 + $0xb0] sm:$0xff]  ;;  %v403_v37 = vmul.f32 %v327_v31, %v327_v31  ;;  %v325_v39 = vld [vmem:[%s1073_s16 + $0xa8] sm:$0xff]  ;;  %v386_v40 = vmul.f32 %v310_v34, %v310_v34  ;;  %v308_v42 = vld [vmem:[%s1073_s16 + $0x20] sm:$0xff]  ;;  %v385_v44 = vmul.f32 %v309_v38, %v309_v38  ;;  %v959_v10 = vmov 0.0  }
  0x2b   : > { %434 = vmatpush.msra.mxu3 %v409_v13  ;;  %360 = vmatpush.msra.mxu1 %v332_v11  ;;  %v402_v41 = vmul.f32 %v326_v35, %v326_v35  ;;  %v324_v43 = vld [vmem:[%s1073_s16 + $0xa0] sm:$0xff]  ;;  %v401_v45 = vmul.f32 %v325_v39, %v325_v39  ;;  %v307_v46 = vld [vmem:[%s1073_s16 + $0x18] sm:$0xff]  ;;  %v384_v48 = vmul.f32 %v308_v42, %v308_v42  ;;  %v306_v50 = vld [vmem:[%s1073_s16 + $0x10] sm:$0xff]  ;;  %p858_p5 = pnand %p857_p4, %p1046_p9  ;;  %p863_p10 = por %p862_p8, %p861_p7 }
  0x2c   : > { %415 = vmatpush.msra.mxu2 %v392_v16  ;;  %341 = vmatpush.msra.mxu0 %v315_v14  ;;  %v323_v47 = vld [vmem:[%s1073_s16 + $0x98] sm:$0xff]  ;;  %v400_v49 = vmul.f32 %v324_v43, %v324_v43  ;;  %v322_v51 = vld [vmem:[%s1073_s16 + $0x90] sm:$0xff]  ;;  %v383_v52 = vmul.f32 %v307_v46, %v307_v46  ;;  %v305_v54 = vld [vmem:[%s1073_s16 + $0x8] sm:$0xff]  ;;  %v382_v56 = vmul.f32 %v306_v50, %v306_v50 }
  0x2d   : > { %435 = vmatpush.msra.mxu3 %v408_v17  ;;  %361 = vmatpush.msra.mxu1 %v331_v15  ;;  %v399_v53 = vmul.f32 %v323_v47, %v323_v47  ;;  %v321_v55 = vld [vmem:[%s1073_s16 + $0x88] sm:$0xff]  ;;  %v398_v57 = vmul.f32 %v322_v51, %v322_v51  ;;  %v304_v58 = vld [vmem:[%s1073_s16] sm:$0xff]  ;;  %v381_v60 = vmul.f32 %v305_v54, %v305_v54  ;;  %v473_v0 = vld [vmem:[%s1244_s1 + $0x78] sm:$0xff]  ;;  %p859_p6 = pneg %p858_p5 }
  0x2e   : > { %416 = vmatpush.msra.mxu2 %v391_v20  ;;  %342 = vmatpush.msra.mxu0 %v314_v18  ;;  %v320_v59 = vld [vmem:[%s1073_s16 + $0x80] sm:$0xff]  ;;  %v397_v61 = vmul.f32 %v321_v55, %v321_v55  ;;  %v380_v62 = vmul.f32 %v304_v58, %v304_v58  ;;  %v472_v2 = vld [vmem:[%s1244_s1 + $0x70] sm:$0xff]  ;;  %v469_v5 = vld [vmem:[%s1244_s1 + $0x58] sm:$0xff]  ;;  %302 = vst [vmem:[#allocation2] sm:$0x1] %v959_v10  ;;  %s1194_s16 = sshll.u32 %s614_s28, 4  ;;  %s619_s16 = int_to_ptr.hbm [resolvable:$true] %s1194_s16 }
  0x2f   : > { %436 = vmatpush.msra.mxu3 %v407_v21  ;;  %362 = vmatpush.msra.mxu1 %v330_v19  ;;  %v396_v63 = vmul.f32 %v320_v59, %v320_v59  ;;  %v471_v3 = vld [vmem:[%s1244_s1 + $0x68] sm:$0xff]  ;;  %v470_v4 = vld [vmem:[%s1244_s1 + $0x60] sm:$0xff]  ;;  %v468_v6 = vld [vmem:[%s1244_s1 + $0x50] sm:$0xff]  ;;  %303 = vst [vmem:[#allocation3] sm:$0x1] %v959_v10  ;;  %p864_p13 = pnand %p863_p10, %p859_p6 }
  0x30   : > { %417 = vmatpush.msra.mxu2 %v390_v24  ;;  %343 = vmatpush.msra.mxu0 %v313_v22  ;;  %v467_v7 = vld [vmem:[%s1244_s1 + $0x48] sm:$0xff]  ;;  %v466_v8 = vld [vmem:[%s1244_s1 + $0x40] sm:$0xff]  ;;  %v465_v9 = vld [vmem:[%s1244_s1 + $0x38] sm:$0xff] }
  0x31   : > { %437 = vmatpush.msra.mxu3 %v406_v25  ;;  %363 = vmatpush.msra.mxu1 %v329_v23  ;;  %v464_v11 = vld [vmem:[%s1244_s1 + $0x30] sm:$0xff]  ;;  %v463_v12 = vld [vmem:[%s1244_s1 + $0x28] sm:$0xff]  ;;  %v462_v13 = vld [vmem:[%s1244_s1 + $0x20] sm:$0xff] }
  0x32   : > { %418 = vmatpush.msra.mxu2 %v389_v28  ;;  %344 = vmatpush.msra.mxu0 %v312_v26  ;;  %v461_v14 = vld [vmem:[%s1244_s1 + $0x18] sm:$0xff]  ;;  %v460_v15 = vld [vmem:[%s1244_s1 + $0x10] sm:$0xff]  ;;  %v459_v16 = vld [vmem:[%s1244_s1 + $0x8] sm:$0xff] }
  0x33   : > { %438 = vmatpush.msra.mxu3 %v405_v29  ;;  %364 = vmatpush.msra.mxu1 %v328_v27  ;;  %v458_v17 = vld [vmem:[%s1244_s1] sm:$0xff]  ;;  %v533_v18 = vld [vmem:[%s1245_s2 + $0x18] sm:$0xff]  ;;  %v532_v19 = vld [vmem:[%s1245_s2 + $0x10] sm:$0xff] }
  0x34   : > { %419 = vmatpush.msra.mxu2 %v388_v32  ;;  %345 = vmatpush.msra.mxu0 %v311_v30  ;;  %v531_v32 = vld [vmem:[%s1245_s2 + $0x8] sm:$0xff] }
  0x35   : > { %439 = vmatpush.msra.mxu3 %v404_v33  ;;  %365 = vmatpush.msra.mxu1 %v327_v31  ;;  %v336_v21 = vld [vmem:[#allocation2] sm:$0x1] }
  0x36   : > { %420 = vmatpush.msra.mxu2 %v387_v36  ;;  %346 = vmatpush.msra.mxu0 %v310_v34  ;;  %v379_v26 = vld [vmem:[#allocation3] sm:$0x1] }
  0x37   : > { %440 = vmatpush.msra.mxu3 %v403_v37  ;;  %366 = vmatpush.msra.mxu1 %v326_v35  ;;  %v530_v33 = vld [vmem:[%s1245_s2] sm:$0xff] }
  0x38   : > { %421 = vmatpush.msra.mxu2 %v386_v40  ;;  %347 = vmatpush.msra.mxu0 %v309_v38 }
  0x39   : > { %441 = vmatpush.msra.mxu3 %v402_v41  ;;  %367 = vmatpush.msra.mxu1 %v325_v39 }
  0x3a   : > { %422 = vmatpush.msra.mxu2 %v385_v44  ;;  %348 = vmatpush.msra.mxu0 %v308_v42 }
  0x3b   : > { %442 = vmatpush.msra.mxu3 %v401_v45  ;;  %368 = vmatpush.msra.mxu1 %v324_v43 }
  0x3c   : > { %423 = vmatpush.msra.mxu2 %v384_v48  ;;  %349 = vmatpush.msra.mxu0 %v307_v46  ;;  %v581_v48 = vld [vmem:[%s1246_s3] sm:$0x1] }
  0x3d   : > { %443 = vmatpush.msra.mxu3 %v400_v49  ;;  %369 = vmatpush.msra.mxu1 %v323_v47 }
  0x3e   : > { %424 = vmatpush.msra.mxu2 %v383_v52  ;;  %350 = vmatpush.msra.mxu0 %v306_v50  ;;  %v584_v52 = vld [vmem:[%s1247_s4] sm:$0x1] }
  0x3f   : > { %444 = vmatpush.msra.mxu3 %v399_v53  ;;  %370 = vmatpush.msra.mxu1 %v322_v51 }
  0x40   : > { %425 = vmatpush.msra.mxu2 %v382_v56  ;;  %351 = vmatpush.msra.mxu0 %v305_v54 }
  0x41   : > { %445 = vmatpush.msra.mxu3 %v398_v57  ;;  %371 = vmatpush.msra.mxu1 %v321_v55 }
  0x42   : > { %426 = vmatpush.msra.mxu2 %v381_v60  ;;  %352 = vmatpush.msra.mxu0 %v304_v58 }
  0x43   : > { %446 = vmatpush.msra.mxu3 %v397_v61  ;;  %372 = vmatpush.msra.mxu1 %v320_v59 }
  0x44   : > { %427 = vmatpush.msra.mxu2 %v380_v62  ;;  %353 = vmatmul.f32.vlgmr.msra.gmra.mxu0 %v958_v1 }
  0x45   : > { %447 = vmatpush.msra.mxu3 %v396_v63  ;;  %428 = vmatmul.f32.vlgmr.msra.gmra.mxu2 %v958_v1 }
  0x46   : > { %448 = vmatmul.f32.vlgmr.msra.gmra.mxu3 %v958_v1  ;;  %373 = vmatmul.f32.vlgmr.msra.gmra.mxu1 %v958_v1 }
  0x47   : > { %474 = vmatpush.msrb.mxu0 %v473_v0  ;;  %495 = vmatpush.msrb.mxu1 %v473_v0 }
  0x48   : > { %550 = vmatpush.msrb.mxu2 %v533_v18  ;;  %573 = vmatpush.msrb.mxu3 %v533_v18 }
  0x49   : > { %475 = vmatpush.msrb.mxu0 %v472_v2  ;;  %496 = vmatpush.msrb.mxu1 %v472_v2 }
  0x4a   : > { %551 = vmatpush.msrb.mxu2 %v532_v19  ;;  %574 = vmatpush.msrb.mxu3 %v532_v19 }
  0x4b   : > { %476 = vmatpush.msrb.mxu0 %v471_v3  ;;  %497 = vmatpush.msrb.mxu1 %v471_v3 }
  0x4c   : > { %552 = vmatpush.msrb.mxu2 %v531_v32  ;;  %575 = vmatpush.msrb.mxu3 %v531_v32 }
  0x4d   : > { %477 = vmatpush.msrb.mxu0 %v470_v4  ;;  %498 = vmatpush.msrb.mxu1 %v470_v4 }
  0x4e   : > { %553 = vmatpush.msrb.mxu2 %v530_v33  ;;  %576 = vmatpush.msrb.mxu3 %v530_v33 }
  0x4f   : > { %478 = vmatpush.msrb.mxu0 %v469_v5  ;;  %499 = vmatpush.msrb.mxu1 %v469_v5 }
  0x51   : > { %479 = vmatpush.msrb.mxu0 %v468_v6  ;;  %500 = vmatpush.msrb.mxu1 %v468_v6 }
  0x53   : > { %480 = vmatpush.msrb.mxu0 %v467_v7  ;;  %501 = vmatpush.msrb.mxu1 %v467_v7 }
  0x55   : > { %481 = vmatpush.msrb.mxu0 %v466_v8  ;;  %502 = vmatpush.msrb.mxu1 %v466_v8 }
  0x57   : > { %482 = vmatpush.msrb.mxu0 %v465_v9  ;;  %503 = vmatpush.msrb.mxu1 %v465_v9 }
  0x59   : > { %483 = vmatpush.msrb.mxu0 %v464_v11  ;;  %504 = vmatpush.msrb.mxu1 %v464_v11 }
  0x5b   : > { %484 = vmatpush.msrb.mxu0 %v463_v12  ;;  %505 = vmatpush.msrb.mxu1 %v463_v12 }
  0x5d   : > { %485 = vmatpush.msrb.mxu0 %v462_v13  ;;  %506 = vmatpush.msrb.mxu1 %v462_v13 }
  0x5f   : > { %486 = vmatpush.msrb.mxu0 %v461_v14  ;;  %507 = vmatpush.msrb.mxu1 %v461_v14 }
  0x61   : > { %487 = vmatpush.msrb.mxu0 %v460_v15  ;;  %508 = vmatpush.msrb.mxu1 %v460_v15 }
  0x63   : > { %488 = vmatpush.msrb.mxu0 %v459_v16  ;;  %509 = vmatpush.msrb.mxu1 %v459_v16 }
  0x65   : > { %489 = vmatpush.msrb.mxu0 %v458_v17  ;;  %510 = vmatpush.msrb.mxu1 %v458_v17 }
  0xc1   : > { %v354_v20 = vpop.f32.mrf.mxu0 }
  0xc3   : > { %v374_v22 = vpop.f32.mrf.mxu1 }
  0xc4   : > { %v375_v23 = vadd.f32 %v374_v22, %v354_v20 }
  0xc6   : > { %v377_v24 = vadd.f32 %v375_v23, %v336_v21 }
  0xc8   : > { %378 = vst [vmem:[#allocation2] sm:$0x1] %v377_v24  ;;  %v429_v25 = vpop.f32.mrf.mxu2 }
  0xc9   : > { %v449_v27 = vpop.f32.mrf.mxu3 }
  0xca   : > { %v450_v28 = vadd.f32 %v449_v27, %v429_v25 }
  0xcc   : > { %v452_v29 = vadd.f32 %v450_v28, %v379_v26 }
  0xce   : > { %453 = vst [vmem:[#allocation3] sm:$0x1] %v452_v29 }
  0xcf   : > { %v457_v30 = vld [vmem:[#allocation2] sm:$0x1] }
  0xd0   : > { %490 = vmatmul.f32.vlgmr.msrb.gmra.mxu0 %v457_v30 }
  0xd5   : > { %v494_v31 = vld [vmem:[#allocation3] sm:$0x1] }
  0xd6   : > { %511 = vmatmul.f32.vlgmr.msrb.gmra.mxu1 %v494_v31 }
 0x14d   : > { %v491_v34 = vpop.f32.mrf.mxu0 }
 0x14e   : > { %v515_v35 = vmul.f32 0.00390625, %v491_v34 }
 0x150   : > { %732 = vmatmul.msk.f32.vlgmr.msrb.gmra.mxu2 %vm534_vm0, %v515_v35  ;;  %v517_v36 = vmul.f32 %v515_v35, %v515_v35 }
 0x153   : > { %v512_v37 = vpop.f32.mrf.mxu1 }
 0x154   : > { %v516_v38 = vmul.f32 0.00390625, %v512_v37 }
 0x156   : > { %v518_v39 = vsub.f32 %v516_v38, %v517_v36 }
 0x158   : > { %v519_v40 = vadd.f32 1e-06, %v518_v39 }
 0x15a   : > { %808 = vrsqrt.f32 %v519_v40  ;;  %vm526_vm2 = vweird.f32 %v519_v40 }
 0x160   : > { %v809_v41 = vpop.eup %808 }
 0x161   : > { %v521_v42 = vmul.f32 %v809_v41, %v519_v40  ;;  %vm527_vm1 = vweird.f32 %v809_v41 }
 0x162   : > { %vm528_vm3 = vmor %vm526_vm2, %vm527_vm1 }
 0x163   : > { %v522_v43 = vmul.f32 %v809_v41, %v521_v42 }
 0x165   : > { %v523_v44 = vmul.f32 0.5, %v522_v43 }
 0x167   : > { %v524_v45 = vsub.f32 1.5, %v523_v44 }
 0x169   : > { %v525_v46 = vmul.f32 %v809_v41, %v524_v45 }
 0x16b   : > { %v529_v47 = vsel %vm528_vm3, %v809_v41, %v525_v46 }
 0x16c   : > { %733 = vmatmul.msk.f32.vlgmr.msrb.gmra.mxu3 %vm534_vm0, %v529_v47 }
 0x1d3   : > { %v555_v51 = vpop.f32.mrf.mxu2 }
 0x1ef   : > { %v578_v49 = vpop.f32.mrf.mxu3 }
 0x1f0   : > { %v582_v50 = vmul.f32 %v581_v48, %v578_v49 }
 0x1f2   : > { %583 = vst [vmem:[%s290_s17] sm:$0x1] %v582_v50  ;;  %v585_v53 = vmul.f32 %v582_v50, %v555_v51 }
 0x1f3   : > { %867 = shalt.err (!%p864_p13)
}
 0x1f4   : > { %739 = dma.vmem_to_hbm [thread:$0]  (%p1046_p9), %s604_s18, 16, %s606_s19, %s589_s7   ;;  %v586_v54 = vsub.f32 %v584_v52, %v585_v53 }
 0x1f5   : > { %s593_s17 = scalar_lea.sflag [#allocation9], %s1069_s29  ;;  %s882_s28 = sshra.s32 %s619_s16, 4  ;;  %s883_s28 = int_to_ptr.hbm [resolvable:$true] %s882_s28 }
 0x1f6   : > { %587 = vst [vmem:[%s296_s14] sm:$0x1] %v586_v54  ;;  %s884_s13 = scalar_lea.hbm %s883_s28, 1  ;;  %s888_s20 = scalar_lea.hbm %s1249_s6, 2 }
 0x1f7   : > { %p885_p0 = scmp.ne.s32.totalorder %s883_s28, %s884_s13  ;;  %p889_p3 = scmp.lt.s32.totalorder %s883_s28, %s1249_s6 }
 0x1f8   : > { %p890_p4 = scmp.lt.s32.totalorder %s888_s20, %s884_s13 }
 0x1f9   : > { %p886_p1 = pnand %p885_p0, %p1046_p9 }
 0x1fa   : > { %p891_p5 = por %p890_p4, %p889_p3 }
 0x1fb   : > { %p887_p2 = pneg %p886_p1 }
 0x1fd   : > { %p892_p6 = pnand %p891_p5, %p887_p2 }
 0x1ff   : > { %895 = shalt.err (!%p892_p6)
}
 0x200   : > { %740 = dma.vmem_to_hbm [thread:$0]  (%p1046_p9), %s617_s15, 16, %s619_s16, %s593_s17  }
 0x201 PF: > { %s630_s29 = sand.u32 1, %s934_s21   ;;  %p748_p7 = pnand %p726_p12, %p1053_p11 }
 0x202   : > { %s631_s18 = scalar_lea.sflag [#allocation6], %s630_s29 }
 0x203   : > { %p749_p8 = pneg %p748_p7 }
 0x205   : > { %925 = dma.done.wait (%p749_p8), %s631_s18, 16  }
 0x206   : > { %927 = vsyncadd (%p749_p8), %s631_s18, 4294967280  ;;  %s640_s19 = scalar_lea.sflag [#allocation9], %s630_s29 }
 0x207   : > { %929 = dma.done.wait (%p749_p8), %s640_s19, 16  }
 0x208   : > { %931 = vsyncadd (%p749_p8), %s640_s19, 4294967280  ;;  %s26_s26 = sadd.s32 1, %s954_s26   ;;  %s1256_s10 = sld [smem:[#allocation13_spill]] }
 0x209   : > { %p23_p10 = scmp.ge.s32.totalorder %s26_s26, 4   ;;  %s1257_s21 = smov %s938_s22 }
 0x20a   : > { %s1258_s22 = smov %s942_s23  ;;  %s1259_s23 = smov %s1051_s11 }
 0x20b   : > { %s1260_s24 = smov %s950_s25  ;;  %25 = sbr.rel (!%p23_p10) target bundleno = 8 (0x8), region = 110 }
 0x20e   : > { %s1261_s25 = smov %s1256_s10 }
 0x210   :  { %645 = vsyncpa [#allocation5], 1 }
 0x211   :  { %647 = vsyncpa [#allocation5 + $0x1], 1 }
 0x212   :  { %648 = vsyncpa [#allocation6], 1 }
 0x213   :  { %650 = vsyncpa [#allocation6 + $0x1], 1 }
 0x214   :  { %651 = vsyncpa [#allocation9], 1 }
 0x215   :  { %653 = vsyncpa [#allocation9 + $0x1], 1 }

</bundles_post_ra>
